<compile_context>
chip_gen: v5e
topology: v5e:2x2
jax: 0.10.0
libtpu: 0.0.40
codegen_flags: <defaults>
</compile_context>

<pallas_src>
import numpy as np
import jax
import jax.numpy as jnp
from jax import lax
from jax.experimental import pallas as pl
from jax.experimental.pallas import tpu as pltpu

N_BATCH, H_IN, W_IN = 2, 21, 64
OUT_DIM = 7
OUT_PAD = 128  # lane-dense padded output width (unmasked vst)

# (kernel_h, kernel_w, pad_h, pad_w) per conv layer; stride is (1, 2) for all.
CONV_SPECS = [
    (3, 4, 1, 1),  # conv1
    (3, 4, 1, 1),  # conv2
    (3, 4, 0, 1),  # conv3
    (3, 4, 0, 1),  # conv4
    (2, 4, 0, 1),  # conv5
    (1, 4, 0, 1),  # conv6
]


# ----------------------------------------------------------------------------
# Pallas kernel: one MXU matmul over the whole batch (no grid, single step).
# ----------------------------------------------------------------------------
def fusion_av_kernel(x_ref, a_ref, b_ref, out_ref):
    """x_ref: (N, H*W) f32; a_ref: (H*W, 128) f32 folded affine map (lanes 7..127
    are zero); b_ref: (1, 128) f32 folded bias; out_ref: (N, 128) f32."""
    out_ref[...] = (
        jnp.dot(x_ref[...], a_ref[...], preferred_element_type=jnp.float32)
        + b_ref[...]
    )


# ----------------------------------------------------------------------------
# Host-side (numpy) folding of the all-linear network into (A, c).
# ----------------------------------------------------------------------------
def conv_operator(k, ph, pw, h_in, w_in, sw=2):
    """Matrix T (h_in*w_in, h_out*w_out) s.t. flatten(conv(x)) = flatten(x) @ T
    for a single-channel conv with kernel k, padding (ph, pw), stride (1, sw)."""
    kh, kw = k.shape
    h_out = h_in + 2 * ph - kh + 1
    w_out = (w_in + 2 * pw - kw) // sw + 1
    t = np.zeros((h_in * w_in, h_out * w_out), np.float32)
    for ho in range(h_out):
        for dh in range(kh):
            hi = ho + dh - ph
            if not (0 <= hi < h_in):
                continue
            for wo in range(w_out):
                for dw in range(kw):
                    wi = sw * wo + dw - pw
                    if 0 <= wi < w_in:
                        t[hi * w_in + wi, ho * w_out + wo] += k[dh, dw]
    return t, h_out, w_out


def fold_affine(conv_params, fc_w, fc_b):
    """Compose conv1..conv6 + fc into A (H_IN*W_IN, 7), c (7,)."""
    h, w = H_IN, W_IN
    a_tot = None
    c_tot = None
    for i, (kh, kw, ph, pw) in enumerate(CONV_SPECS):
        k = np.asarray(conv_params[i][0], np.float32)[0, 0]      # (kh, kw)
        b = float(np.asarray(conv_params[i][1]).reshape(-1)[0])  # scalar bias
        t, h, w = conv_operator(k, ph, pw, h, w)
        if a_tot is None:
            a_tot = t
            c_tot = np.full((h * w,), b, np.float32)
        else:
            a_tot = a_tot @ t
            c_tot = c_tot @ t + b
    assert h * w == 16, f"flattened feature size {h * w} != 16 (fc expects 16)"
    fw = np.asarray(fc_w, np.float32)            # (7, 16)
    fb = np.asarray(fc_b, np.float32)            # (7,)
    a_final = a_tot @ fw.T                       # (H_IN*W_IN, 7)
    c_final = c_tot @ fw.T + fb                  # (7,)
    return a_final, c_final


# ----------------------------------------------------------------------------
# Wrapper
# ----------------------------------------------------------------------------
def fusion_av_forward(x_nchw, conv_params, fc_w, fc_b):
    n = x_nchw.shape[0]
    feat = H_IN * W_IN

    a_np, c_np = fold_affine(conv_params, fc_w, fc_b)
    a_pad = np.zeros((feat, OUT_PAD), np.float32)
    a_pad[:, :OUT_DIM] = a_np
    c_pad = np.zeros((1, OUT_PAD), np.float32)
    c_pad[0, :OUT_DIM] = c_np

    # NCHW with C=1 -> row-major (H*W) flatten matches the operator indexing.
    x_flat = jnp.asarray(x_nchw, jnp.float32).reshape(n, feat)

    bytes_accessed = 4 * (n * feat + feat * OUT_PAD + OUT_PAD + n * OUT_PAD)
    out_pad = pl.pallas_call(
        fusion_av_kernel,
        out_shape=jax.ShapeDtypeStruct((n, OUT_PAD), jnp.float32),
        in_specs=[
            pl.BlockSpec(memory_space=pltpu.MemorySpace.VMEM),  # x_flat
            pl.BlockSpec(memory_space=pltpu.MemorySpace.VMEM),  # folded A
            pl.BlockSpec(memory_space=pltpu.MemorySpace.VMEM),  # folded bias
        ],
        out_specs=pl.BlockSpec(memory_space=pltpu.MemorySpace.VMEM),
        cost_estimate=pl.CostEstimate(
            flops=2 * n * feat * OUT_PAD,
            transcendentals=0,
            bytes_accessed=bytes_accessed,
        ),
    )(x_flat, jnp.asarray(a_pad), jnp.asarray(c_pad))

    return out_pad[:, :OUT_DIM]


# ----------------------------------------------------------------------------
# Plain-JAX reference matching PyTorch FusionAV semantics (for validation).
# ----------------------------------------------------------------------------
def reference_forward(x_nchw, conv_params, fc_w, fc_b):
    y = jnp.asarray(x_nchw, jnp.float32)
    for i, (kh, kw, ph, pw) in enumerate(CONV_SPECS):
        w_, b_ = conv_params[i]
        y = lax.conv_general_dilated(
            y, jnp.asarray(w_, jnp.float32),
            window_strides=(1, 2),
            padding=((ph, ph), (pw, pw)),
            dimension_numbers=("NCHW", "OIHW", "NCHW"),
        ) + jnp.asarray(b_, jnp.float32).reshape(1, -1, 1, 1)
    yf = y.reshape(y.shape[0], -1)
    return yf @ jnp.asarray(fc_w, jnp.float32).T + jnp.asarray(fc_b, jnp.float32)


if __name__ == "__main__":
    key = jax.random.PRNGKey(0)
    keys = jax.random.split(key, 15)

    # Deterministic synthetic parameters (shapes from FusionAV.__init__).
    conv_params = []
    for i, (kh, kw, ph, pw) in enumerate(CONV_SPECS):
        w = jax.random.normal(keys[2 * i], (1, 1, kh, kw), jnp.float32) * 0.3
        b = jax.random.normal(keys[2 * i + 1], (1,), jnp.float32) * 0.1
        conv_params.append((w, b))
    fc_w = jax.random.normal(keys[12], (OUT_DIM, 16), jnp.float32) * 0.2
    fc_b = jax.random.normal(keys[13], (OUT_DIM,), jnp.float32) * 0.1

    x = jax.random.normal(keys[14], (N_BATCH, 1, H_IN, W_IN), jnp.float32)

    out = fusion_av_forward(x, conv_params, fc_w, fc_b)
    out = jax.block_until_ready(out)

    ref = jax.block_until_ready(reference_forward(x, conv_params, fc_w, fc_b))
    np.testing.assert_allclose(np.asarray(out), np.asarray(ref),
                               rtol=1e-4, atol=1e-4)

    assert out.shape == (N_BATCH, OUT_DIM)
    print("KERNEL_OK")
</pallas_src>

<mosaic_0001>
module attributes {stable_mosaic.version = 11 : i64} {
  func.func @fusion_av_kernel(%arg0: memref<2x1344xf32, #tpu.memory_space<vmem>>, %arg1: memref<1344x128xf32, #tpu.memory_space<vmem>>, %arg2: memref<1x128xf32, #tpu.memory_space<vmem>>, %arg3: memref<2x128xf32, #tpu.memory_space<vmem>>) attributes {dimension_semantics = [], scalar_prefetch = 0 : i64, scratch_operands = 0 : i64, tpu.core_type = #tpu.core_type<tc>} {
    %c0 = arith.constant 0 : index
    %c0_0 = arith.constant 0 : index
    %0 = vector.load %arg0[%c0, %c0_0] : memref<2x1344xf32, #tpu.memory_space<vmem>>, vector<2x1344xf32>
    %c0_1 = arith.constant 0 : index
    %c0_2 = arith.constant 0 : index
    %1 = vector.load %arg1[%c0_1, %c0_2] : memref<1344x128xf32, #tpu.memory_space<vmem>>, vector<1344x128xf32>
    %cst = arith.constant dense<0.000000e+00> : vector<2x128xf32>
    %2 = tpu.matmul %0, %1, %cst {dimension_numbers = #tpu.dot_dimension_numbers<[1], [0], [0], [1], [0, 0, 1, 1], [], []>} : vector<2x1344xf32>, vector<1344x128xf32>, vector<2x128xf32> -> vector<2x128xf32>
    %c0_3 = arith.constant 0 : index
    %c0_4 = arith.constant 0 : index
    %3 = vector.load %arg2[%c0_3, %c0_4] : memref<1x128xf32, #tpu.memory_space<vmem>>, vector<1x128xf32>
    %4 = vector.broadcast %3 : vector<1x128xf32> to vector<2x128xf32>
    %5 = arith.addf %2, %4 : vector<2x128xf32>
    %c0_5 = arith.constant 0 : index
    %c0_6 = arith.constant 0 : index
    %6 = vector.load %arg3[%c0_5, %c0_6] : memref<2x128xf32, #tpu.memory_space<vmem>>, vector<2x128xf32>
    tpu.vector_store %arg3[%c0_5, %c0_6], %5 {strides = array<i32>} : memref<2x128xf32, #tpu.memory_space<vmem>>, vector<2x128xf32>,
    return
  }
}

</mosaic_0001>

<bundles_post_ra>
// kernel: tpu_custom_call.1
= control target key start
LH: loop header
LB: loop body
LE: loop exit
PB: predicated region body
PF: predicated region fallthrough
CT: control target
= control target key end

     0   :  { %8 = vsyncpa [#allocation3], 0  ;;  %s615_s0 = inlined_call_operand.hbm [shape: f32[2,1344], index: 0, kind: input, shape index: {}]   ;;  %s616_s1 = inlined_call_operand.hbm [shape: f32[1344,128], index: 1, kind: input, shape index: {}]   ;;  %s617_s2 = inlined_call_operand.vmem [shape: f32[1,128], index: 2, kind: input, shape index: {}]   ;;  %s618_s3 = inlined_call_operand.hbm [shape: f32[2,128], index: 3, kind: output, shape index: {}]  }
   0x1   :  { %9 = vsyncpa [#allocation6], 0 }
   0x2   :  { %10 = vsyncpa [#allocation4], 0  ;;  %s16_s14 = sshll.u32 %s615_s0, 4  ;;  %s575_s15 = smov [#allocation2]   ;;  %s17_s14 = int_to_ptr.hbm [resolvable:$true] %s16_s14 }
   0x3   :  { %s18_s16 = sshll.u32 %s575_s15, 4  ;;  %s26_s19 = sshll.u32 %s616_s1, 4  ;;  %s19_s16 = int_to_ptr.vmem [resolvable:$true] %s18_s16  ;;  %s27_s19 = int_to_ptr.hbm [resolvable:$true] %s26_s19 }
   0x4   :  { %21 = dma.hbm_to_vmem [thread:$0]  %s17_s14, 352, %s19_s16, [#allocation3]  }
   0x5   :  { %s576_s20 = smov [#allocation5]   ;;  %s577_s22 = smov 128  }
   0x6   :  { %s28_s21 = sshll.u32 %s576_s20, 4  ;;  %s578_s23 = smov 8   ;;  %s29_s21 = int_to_ptr.vmem [resolvable:$true] %s28_s21 }
   0x7   :  { %34 = dma.hbm_to_vmem [thread:$0]  %s27_s19, 21504, %s29_s21, [#allocation6], %s577_s22, %s577_s22, %s578_s23  }
   0x8   :  { %569 = dma.done.wait [#allocation3], 352  }
   0x9   :  { %570 = vsyncadd [#allocation3], 4294966944 }
   0xa   :  { %571 = dma.done.wait [#allocation6], 21504  }
   0xb   :  { %572 = vsyncadd [#allocation6], 4294945792  ;;  %v63_v0 = vld [vmem:[#allocation5 + $0x78] sm:$0xff]  ;;  %v62_v1 = vld [vmem:[#allocation5 + $0x70] sm:$0xff]  ;;  %vm248_vm0 = vcmask 523264   ;;  %s479_s27 = sshll.u32 %s618_s3, 4  ;;  %s480_s27 = int_to_ptr.hbm [resolvable:$true] %s479_s27 }
   0xc   :  { %v79_v2 = vld [vmem:[#allocation5 + $0xf8] sm:$0xff]  ;;  %251 = vmatpush.msra.mxu0 %v63_v0  ;;  %v78_v3 = vld [vmem:[#allocation5 + $0xf0] sm:$0xff]  ;;  %v61_v4 = vld [vmem:[#allocation5 + $0x68] sm:$0xff] }
   0xd   :  { %271 = vmatpush.msra.mxu1 %v79_v2  ;;  %v77_v5 = vld [vmem:[#allocation5 + $0xe8] sm:$0xff]  ;;  %v95_v6 = vld [vmem:[#allocation5 + $0x178] sm:$0xff]  ;;  %v94_v7 = vld [vmem:[#allocation5 + $0x170] sm:$0xff] }
   0xe   :  { %252 = vmatpush.msra.mxu0 %v62_v1  ;;  %v111_v8 = vld [vmem:[#allocation5 + $0x1f8] sm:$0xff]  ;;  %v60_v9 = vld [vmem:[#allocation5 + $0x60] sm:$0xff]  ;;  %291 = vmatpush.msra.mxu2 %v95_v6  ;;  %v93_v11 = vld [vmem:[#allocation5 + $0x168] sm:$0xff] }
   0xf   :  { %272 = vmatpush.msra.mxu1 %v78_v3  ;;  %v76_v10 = vld [vmem:[#allocation5 + $0xe0] sm:$0xff]  ;;  %311 = vmatpush.msra.mxu3 %v111_v8  ;;  %v110_v12 = vld [vmem:[#allocation5 + $0x1f0] sm:$0xff]  ;;  %v59_v13 = vld [vmem:[#allocation5 + $0x58] sm:$0xff] }
  0x10   :  { %253 = vmatpush.msra.mxu0 %v61_v4  ;;  %292 = vmatpush.msra.mxu2 %v94_v7  ;;  %v75_v14 = vld [vmem:[#allocation5 + $0xd8] sm:$0xff]  ;;  %v109_v15 = vld [vmem:[#allocation5 + $0x1e8] sm:$0xff]  ;;  %v92_v16 = vld [vmem:[#allocation5 + $0x160] sm:$0xff] }
  0x11   :  { %273 = vmatpush.msra.mxu1 %v77_v5  ;;  %312 = vmatpush.msra.mxu3 %v110_v12  ;;  %v108_v17 = vld [vmem:[#allocation5 + $0x1e0] sm:$0xff]  ;;  %v58_v18 = vld [vmem:[#allocation5 + $0x50] sm:$0xff]  ;;  %v91_v20 = vld [vmem:[#allocation5 + $0x158] sm:$0xff] }
  0x12   :  { %254 = vmatpush.msra.mxu0 %v60_v9  ;;  %293 = vmatpush.msra.mxu2 %v93_v11  ;;  %v74_v19 = vld [vmem:[#allocation5 + $0xd0] sm:$0xff]  ;;  %v107_v21 = vld [vmem:[#allocation5 + $0x1d8] sm:$0xff]  ;;  %v57_v22 = vld [vmem:[#allocation5 + $0x48] sm:$0xff] }
  0x13   :  { %274 = vmatpush.msra.mxu1 %v76_v10  ;;  %313 = vmatpush.msra.mxu3 %v109_v15  ;;  %v73_v23 = vld [vmem:[#allocation5 + $0xc8] sm:$0xff]  ;;  %v90_v24 = vld [vmem:[#allocation5 + $0x150] sm:$0xff]  ;;  %v56_v26 = vld [vmem:[#allocation5 + $0x40] sm:$0xff] }
  0x14   :  { %255 = vmatpush.msra.mxu0 %v59_v13  ;;  %294 = vmatpush.msra.mxu2 %v92_v16  ;;  %v106_v25 = vld [vmem:[#allocation5 + $0x1d0] sm:$0xff]  ;;  %v72_v27 = vld [vmem:[#allocation5 + $0xc0] sm:$0xff]  ;;  %v89_v28 = vld [vmem:[#allocation5 + $0x148] sm:$0xff] }
  0x15   :  { %275 = vmatpush.msra.mxu1 %v75_v14  ;;  %314 = vmatpush.msra.mxu3 %v108_v17  ;;  %v105_v29 = vld [vmem:[#allocation5 + $0x1c8] sm:$0xff]  ;;  %v55_v30 = vld [vmem:[#allocation5 + $0x38] sm:$0xff]  ;;  %v88_v32 = vld [vmem:[#allocation5 + $0x140] sm:$0xff] }
  0x16   :  { %256 = vmatpush.msra.mxu0 %v58_v18  ;;  %295 = vmatpush.msra.mxu2 %v91_v20  ;;  %v71_v31 = vld [vmem:[#allocation5 + $0xb8] sm:$0xff]  ;;  %v104_v33 = vld [vmem:[#allocation5 + $0x1c0] sm:$0xff]  ;;  %v54_v34 = vld [vmem:[#allocation5 + $0x30] sm:$0xff] }
  0x17   :  { %276 = vmatpush.msra.mxu1 %v74_v19  ;;  %315 = vmatpush.msra.mxu3 %v107_v21  ;;  %v70_v35 = vld [vmem:[#allocation5 + $0xb0] sm:$0xff]  ;;  %v87_v36 = vld [vmem:[#allocation5 + $0x138] sm:$0xff]  ;;  %v53_v38 = vld [vmem:[#allocation5 + $0x28] sm:$0xff] }
  0x18   :  { %257 = vmatpush.msra.mxu0 %v57_v22  ;;  %296 = vmatpush.msra.mxu2 %v90_v24  ;;  %v103_v37 = vld [vmem:[#allocation5 + $0x1b8] sm:$0xff]  ;;  %v69_v39 = vld [vmem:[#allocation5 + $0xa8] sm:$0xff]  ;;  %v86_v40 = vld [vmem:[#allocation5 + $0x130] sm:$0xff] }
  0x19   :  { %277 = vmatpush.msra.mxu1 %v73_v23  ;;  %316 = vmatpush.msra.mxu3 %v106_v25  ;;  %v102_v41 = vld [vmem:[#allocation5 + $0x1b0] sm:$0xff]  ;;  %v52_v42 = vld [vmem:[#allocation5 + $0x20] sm:$0xff]  ;;  %v85_v44 = vld [vmem:[#allocation5 + $0x128] sm:$0xff] }
  0x1a   :  { %258 = vmatpush.msra.mxu0 %v56_v26  ;;  %297 = vmatpush.msra.mxu2 %v89_v28  ;;  %v68_v43 = vld [vmem:[#allocation5 + $0xa0] sm:$0xff]  ;;  %v101_v45 = vld [vmem:[#allocation5 + $0x1a8] sm:$0xff]  ;;  %v51_v46 = vld [vmem:[#allocation5 + $0x18] sm:$0xff] }
  0x1b   :  { %278 = vmatpush.msra.mxu1 %v72_v27  ;;  %317 = vmatpush.msra.mxu3 %v105_v29  ;;  %v67_v47 = vld [vmem:[#allocation5 + $0x98] sm:$0xff]  ;;  %v84_v48 = vld [vmem:[#allocation5 + $0x120] sm:$0xff]  ;;  %v50_v50 = vld [vmem:[#allocation5 + $0x10] sm:$0xff] }
  0x1c   :  { %259 = vmatpush.msra.mxu0 %v55_v30  ;;  %298 = vmatpush.msra.mxu2 %v88_v32  ;;  %v100_v49 = vld [vmem:[#allocation5 + $0x1a0] sm:$0xff]  ;;  %v66_v51 = vld [vmem:[#allocation5 + $0x90] sm:$0xff]  ;;  %v83_v52 = vld [vmem:[#allocation5 + $0x118] sm:$0xff] }
  0x1d   :  { %279 = vmatpush.msra.mxu1 %v71_v31  ;;  %318 = vmatpush.msra.mxu3 %v104_v33  ;;  %v99_v53 = vld [vmem:[#allocation5 + $0x198] sm:$0xff]  ;;  %v49_v54 = vld [vmem:[#allocation5 + $0x8] sm:$0xff]  ;;  %v82_v56 = vld [vmem:[#allocation5 + $0x110] sm:$0xff] }
  0x1e   :  { %260 = vmatpush.msra.mxu0 %v54_v34  ;;  %299 = vmatpush.msra.mxu2 %v87_v36  ;;  %v65_v55 = vld [vmem:[#allocation5 + $0x88] sm:$0xff]  ;;  %v98_v57 = vld [vmem:[#allocation5 + $0x190] sm:$0xff]  ;;  %v48_v58 = vld [vmem:[#allocation5] sm:$0xff] }
  0x1f   :  { %280 = vmatpush.msra.mxu1 %v70_v35  ;;  %319 = vmatpush.msra.mxu3 %v103_v37  ;;  %v64_v59 = vld [vmem:[#allocation5 + $0x80] sm:$0xff]  ;;  %v127_v60 = vld [vmem:[#allocation5 + $0x278] sm:$0xff]  ;;  %v81_v62 = vld [vmem:[#allocation5 + $0x108] sm:$0xff] }
  0x20   :  { %261 = vmatpush.msra.mxu0 %v53_v38  ;;  %300 = vmatpush.msra.mxu2 %v86_v40  ;;  %v143_v61 = vld [vmem:[#allocation5 + $0x2f8] sm:$0xff]  ;;  %v97_v63 = vld [vmem:[#allocation5 + $0x188] sm:$0xff]  ;;  %v126_v0 = vld [vmem:[#allocation5 + $0x270] sm:$0xff] }
  0x21   :  { %281 = vmatpush.msra.mxu1 %v69_v39  ;;  %320 = vmatpush.msra.mxu3 %v102_v41  ;;  %v142_v1 = vld [vmem:[#allocation5 + $0x2f0] sm:$0xff]  ;;  %v80_v2 = vld [vmem:[#allocation5 + $0x100] sm:$0xff]  ;;  %v125_v4 = vld [vmem:[#allocation5 + $0x268] sm:$0xff] }
  0x22   :  { %262 = vmatpush.msra.mxu0 %v52_v42  ;;  %301 = vmatpush.msra.mxu2 %v85_v44  ;;  %v96_v3 = vld [vmem:[#allocation5 + $0x180] sm:$0xff]  ;;  %v141_v5 = vld [vmem:[#allocation5 + $0x2e8] sm:$0xff]  ;;  %v159_v6 = vld [vmem:[#allocation5 + $0x378] sm:$0xff] }
  0x23   :  { %282 = vmatpush.msra.mxu1 %v68_v43  ;;  %321 = vmatpush.msra.mxu3 %v101_v45  ;;  %v175_v7 = vld [vmem:[#allocation5 + $0x3f8] sm:$0xff]  ;;  %v124_v8 = vld [vmem:[#allocation5 + $0x260] sm:$0xff]  ;;  %v158_v10 = vld [vmem:[#allocation5 + $0x370] sm:$0xff] }
  0x24   :  { %263 = vmatpush.msra.mxu0 %v51_v46  ;;  %302 = vmatpush.msra.mxu2 %v84_v48  ;;  %v140_v9 = vld [vmem:[#allocation5 + $0x2e0] sm:$0xff]  ;;  %v174_v11 = vld [vmem:[#allocation5 + $0x3f0] sm:$0xff]  ;;  %v123_v12 = vld [vmem:[#allocation5 + $0x258] sm:$0xff] }
  0x25   :  { %283 = vmatpush.msra.mxu1 %v67_v47  ;;  %322 = vmatpush.msra.mxu3 %v100_v49  ;;  %v139_v13 = vld [vmem:[#allocation5 + $0x2d8] sm:$0xff]  ;;  %v157_v14 = vld [vmem:[#allocation5 + $0x368] sm:$0xff]  ;;  %v122_v17 = vld [vmem:[#allocation5 + $0x250] sm:$0xff] }
  0x26   :  { %264 = vmatpush.msra.mxu0 %v50_v50  ;;  %303 = vmatpush.msra.mxu2 %v83_v52  ;;  %v173_v15 = vld [vmem:[#allocation5 + $0x3e8] sm:$0xff]  ;;  %v138_v18 = vld [vmem:[#allocation5 + $0x2d0] sm:$0xff]  ;;  %v156_v19 = vld [vmem:[#allocation5 + $0x360] sm:$0xff] }
  0x27   :  { %284 = vmatpush.msra.mxu1 %v66_v51  ;;  %323 = vmatpush.msra.mxu3 %v99_v53  ;;  %v45_v16 = vld [vmem:[#allocation2] sm:$0xff]  ;;  %v172_v20 = vld [vmem:[#allocation5 + $0x3e0] sm:$0xff]  ;;  %v155_v24 = vld [vmem:[#allocation5 + $0x358] sm:$0xff] }
  0x28   :  { %265 = vmatpush.msra.mxu0 %v49_v54  ;;  %304 = vmatpush.msra.mxu2 %v82_v56  ;;  %223 = vst [vmem:[#allocation1] ss:$4 sm:$0xff] %v45_v16  ;;  %v121_v21 = vld [vmem:[#allocation5 + $0x248] sm:$0xff]  ;;  %v120_v23 = vld [vmem:[#allocation5 + $0x240] sm:$0xff]  ;;  %v171_v25 = vld [vmem:[#allocation5 + $0x3d8] sm:$0xff] }
  0x29   :  { %285 = vmatpush.msra.mxu1 %v65_v55  ;;  %324 = vmatpush.msra.mxu3 %v98_v57  ;;  %v137_v22 = vld [vmem:[#allocation5 + $0x2c8] sm:$0xff]  ;;  %v119_v26 = vld [vmem:[#allocation5 + $0x238] sm:$0xff]  ;;  %v136_v27 = vld [vmem:[#allocation5 + $0x2c0] sm:$0xff] }
  0x2a   :  { %266 = vmatpush.msra.mxu0 %v48_v58  ;;  %305 = vmatpush.msra.mxu2 %v81_v62  ;;  %v154_v28 = vld [vmem:[#allocation5 + $0x350] sm:$0xff]  ;;  %v135_v29 = vld [vmem:[#allocation5 + $0x2b8] sm:$0xff]  ;;  %v153_v30 = vld [vmem:[#allocation5 + $0x348] sm:$0xff] }
  0x2b   :  { %286 = vmatpush.msra.mxu1 %v64_v59  ;;  %325 = vmatpush.msra.mxu3 %v97_v63  ;;  %v170_v31 = vld [vmem:[#allocation5 + $0x3d0] sm:$0xff]  ;;  %v169_v35 = vld [vmem:[#allocation5 + $0x3c8] sm:$0xff]  ;;  %v47_v36 = vld [vmem:[#allocation2 + $0x10] sm:$0x3f] }
  0x2c   :  { %331 = vmatpush.msrb.mxu0 %v127_v60  ;;  %306 = vmatpush.msra.mxu2 %v80_v2  ;;  %v46_v32 = vld [vmem:[#allocation2 + $0x8] sm:$0xff]  ;;  %v152_v41 = vld [vmem:[#allocation5 + $0x340] sm:$0xff]  ;;  %v117_v43 = vld [vmem:[#allocation5 + $0x228] sm:$0xff] }
  0x2d   :  { %351 = vmatpush.msrb.mxu1 %v143_v61  ;;  %326 = vmatpush.msra.mxu3 %v96_v3  ;;  %v118_v33 = vld [vmem:[#allocation5 + $0x230] sm:$0xff]  ;;  %225 = vst [vmem:[#allocation1 + $0x20] ss:$4 sm:$0xff] %v46_v32  ;;  %v168_v42 = vld [vmem:[#allocation5 + $0x3c0] sm:$0xff]  ;;  %v133_v44 = vld [vmem:[#allocation5 + $0x2a8] sm:$0xff] }
  0x2e   :  { %332 = vmatpush.msrb.mxu0 %v126_v0  ;;  %371 = vmatpush.msrb.mxu2 %v159_v6  ;;  %v134_v34 = vld [vmem:[#allocation5 + $0x2b0] sm:$0xff]  ;;  %v151_v45 = vld [vmem:[#allocation5 + $0x338] sm:$0xff]  ;;  %v116_v47 = vld [vmem:[#allocation5 + $0x220] sm:$0xff] }
  0x2f   :  { %352 = vmatpush.msrb.mxu1 %v142_v1  ;;  %391 = vmatpush.msrb.mxu3 %v175_v7  ;;  %v228_v37 = vld.sshfl [vmem:[#allocation1 + $0x10] sm:$0xff pattern:$0x73625140]  ;;  %v226_v38 = vld.sshfl [vmem:[#allocation1] sm:$0xff pattern:$0x73625140] }
  0x30   :  { %333 = vmatpush.msrb.mxu0 %v125_v4  ;;  %372 = vmatpush.msrb.mxu2 %v158_v10  ;;  %v229_v39 = vld.sshfl [vmem:[#allocation1 + $0x18] sm:$0xff pattern:$0x73625140]  ;;  %v606_v40 = vld.sshfl [vmem:[#allocation1 + $0x8] sm:$0xff pattern:$0x73625140] }
  0x31   :  { %353 = vmatpush.msrb.mxu1 %v141_v5  ;;  %392 = vmatpush.msrb.mxu3 %v174_v11  ;;  %234 = vst [vmem:[#allocation1] ss:$4 sm:$0xff] %v47_v36  ;;  %v167_v46 = vld [vmem:[#allocation5 + $0x3b8] sm:$0xff]  ;;  %v132_v48 = vld [vmem:[#allocation5 + $0x2a0] sm:$0xff]  ;;  %v150_v49 = vld [vmem:[#allocation5 + $0x330] sm:$0xff] }
  0x32   :  { %334 = vmatpush.msrb.mxu0 %v124_v8  ;;  %373 = vmatpush.msrb.mxu2 %v157_v14  ;;  %v166_v50 = vld [vmem:[#allocation5 + $0x3b0] sm:$0xff]  ;;  %v115_v51 = vld [vmem:[#allocation5 + $0x218] sm:$0xff]  ;;  %v149_v53 = vld [vmem:[#allocation5 + $0x328] sm:$0xff] }
  0x33   :  { %354 = vmatpush.msrb.mxu1 %v140_v9  ;;  %393 = vmatpush.msrb.mxu3 %v173_v15  ;;  %v131_v52 = vld [vmem:[#allocation5 + $0x298] sm:$0xff]  ;;  %v165_v54 = vld [vmem:[#allocation5 + $0x3a8] sm:$0xff]  ;;  %v114_v55 = vld [vmem:[#allocation5 + $0x210] sm:$0xff] }
  0x34   :  { %335 = vmatpush.msrb.mxu0 %v123_v12  ;;  %374 = vmatpush.msrb.mxu2 %v156_v19  ;;  %v130_v56 = vld [vmem:[#allocation5 + $0x290] sm:$0xff]  ;;  %v148_v57 = vld [vmem:[#allocation5 + $0x320] sm:$0xff]  ;;  %v113_v59 = vld [vmem:[#allocation5 + $0x208] sm:$0xff] }
  0x35   :  { %355 = vmatpush.msrb.mxu1 %v139_v13  ;;  %394 = vmatpush.msrb.mxu3 %v172_v20  ;;  %v164_v58 = vld [vmem:[#allocation5 + $0x3a0] sm:$0xff]  ;;  %v129_v60 = vld [vmem:[#allocation5 + $0x288] sm:$0xff]  ;;  %v147_v61 = vld [vmem:[#allocation5 + $0x318] sm:$0xff] }
  0x36   :  { %336 = vmatpush.msrb.mxu0 %v122_v17  ;;  %375 = vmatpush.msrb.mxu2 %v155_v24  ;;  %v112_v62 = vld [vmem:[#allocation5 + $0x200] sm:$0xff]  ;;  %v191_v0 = vld [vmem:[#allocation5 + $0x478] sm:$0xff]  ;;  %v146_v1 = vld [vmem:[#allocation5 + $0x310] sm:$0xff] }
  0x37   :  { %356 = vmatpush.msrb.mxu1 %v138_v18  ;;  %395 = vmatpush.msrb.mxu3 %v171_v25  ;;  %v128_v63 = vld [vmem:[#allocation5 + $0x280] sm:$0xff]  ;;  %v163_v2 = vld [vmem:[#allocation5 + $0x398] sm:$0xff]  ;;  %v190_v3 = vld [vmem:[#allocation5 + $0x470] sm:$0xff] }
  0x38   :  { %337 = vmatpush.msrb.mxu0 %v121_v21  ;;  %376 = vmatpush.msrb.mxu2 %v154_v28  ;;  %v207_v4 = vld [vmem:[#allocation5 + $0x4f8] sm:$0xff]  ;;  %v145_v5 = vld [vmem:[#allocation5 + $0x308] sm:$0xff]  ;;  %v162_v6 = vld [vmem:[#allocation5 + $0x390] sm:$0xff] }
  0x39   :  { %357 = vmatpush.msrb.mxu1 %v137_v22  ;;  %396 = vmatpush.msrb.mxu3 %v170_v31  ;;  %v189_v7 = vld [vmem:[#allocation5 + $0x468] sm:$0xff]  ;;  %v206_v8 = vld [vmem:[#allocation5 + $0x4f0] sm:$0xff]  ;;  %v144_v9 = vld [vmem:[#allocation5 + $0x300] sm:$0xff] }
  0x3a   :  { %338 = vmatpush.msrb.mxu0 %v120_v23  ;;  %377 = vmatpush.msrb.mxu2 %v153_v30  ;;  %v161_v10 = vld [vmem:[#allocation5 + $0x388] sm:$0xff]  ;;  %v232_v11 = vld.sshfl [vmem:[#allocation1 + $0x30] sm:$0xff pattern:$0x73625140]  ;;  %v188_v12 = vld [vmem:[#allocation5 + $0x460] sm:$0xff] }
  0x3b   :  { %358 = vmatpush.msrb.mxu1 %v136_v27  ;;  %397 = vmatpush.msrb.mxu3 %v169_v35  ;;  %v205_v13 = vld [vmem:[#allocation5 + $0x4e8] sm:$0xff]  ;;  %v160_v14 = vld [vmem:[#allocation5 + $0x380] sm:$0xff]  ;;  %v187_v17 = vld [vmem:[#allocation5 + $0x458] sm:$0xff] }
  0x3c   :  { %339 = vmatpush.msrb.mxu0 %v119_v26  ;;  %378 = vmatpush.msrb.mxu2 %v152_v41  ;;  %v230_v15 = vld.sshfl [vmem:[#allocation1 + $0x20] sm:$0xff pattern:$0x73625140]  ;;  %v233_v16 = vld.sshfl [vmem:[#allocation1 + $0x38] sm:$0xff pattern:$0x73625140] }
  0x3d   :  { %359 = vmatpush.msrb.mxu1 %v135_v29  ;;  %398 = vmatpush.msrb.mxu3 %v168_v42  ;;  %v204_v18 = vld [vmem:[#allocation5 + $0x4e0] sm:$0xff]  ;;  %v231_v19 = vld.sshfl [vmem:[#allocation1 + $0x28] sm:$0xff pattern:$0x73625140]  ;;  %v215_v20 = vld [vmem:[#allocation5 + $0x538] sm:$0xff] }
  0x3e   :  { %340 = vmatpush.msrb.mxu0 %v118_v33  ;;  %379 = vmatpush.msrb.mxu2 %v151_v45  ;;  %v186_v21 = vld [vmem:[#allocation5 + $0x450] sm:$0xff]  ;;  %v203_v22 = vld [vmem:[#allocation5 + $0x4d8] sm:$0xff]  ;;  %v185_v24 = vld [vmem:[#allocation5 + $0x448] sm:$0xff] }
  0x3f   :  { %360 = vmatpush.msrb.mxu1 %v134_v34  ;;  %399 = vmatpush.msrb.mxu3 %v167_v46  ;;  %v214_v23 = vld [vmem:[#allocation5 + $0x530] sm:$0xff]  ;;  %v213_v26 = vld [vmem:[#allocation5 + $0x528] sm:$0xff]  ;;  %v184_v27 = vld [vmem:[#allocation5 + $0x440] sm:$0xff] }
  0x40   :  { %341 = vmatpush.msrb.mxu0 %v117_v43  ;;  %380 = vmatpush.msrb.mxu2 %v150_v49  ;;  %v202_v25 = vld [vmem:[#allocation5 + $0x4d0] sm:$0xff]  ;;  %v201_v28 = vld [vmem:[#allocation5 + $0x4c8] sm:$0xff]  ;;  %v212_v29 = vld [vmem:[#allocation5 + $0x520] sm:$0xff] }
  0x41   :  { %361 = vmatpush.msrb.mxu1 %v133_v44  ;;  %400 = vmatpush.msrb.mxu3 %v166_v50  ;;  %v183_v30 = vld [vmem:[#allocation5 + $0x438] sm:$0xff]  ;;  %v200_v31 = vld [vmem:[#allocation5 + $0x4c0] sm:$0xff]  ;;  %v182_v33 = vld [vmem:[#allocation5 + $0x430] sm:$0xff] }
  0x42   :  { %342 = vmatpush.msrb.mxu0 %v116_v47  ;;  %381 = vmatpush.msrb.mxu2 %v149_v53  ;;  %v211_v32 = vld [vmem:[#allocation5 + $0x518] sm:$0xff]  ;;  %v210_v35 = vld [vmem:[#allocation5 + $0x510] sm:$0xff]  ;;  %v181_v36 = vld [vmem:[#allocation5 + $0x428] sm:$0xff] }
  0x43   :  { %362 = vmatpush.msrb.mxu1 %v132_v48  ;;  %401 = vmatpush.msrb.mxu3 %v165_v54  ;;  %v199_v34 = vld [vmem:[#allocation5 + $0x4b8] sm:$0xff]  ;;  %v208_v41 = vld [vmem:[#allocation5 + $0x500] sm:$0xff]  ;;  %v178_v45 = vld [vmem:[#allocation5 + $0x410] sm:$0xff] }
  0x44   :  { %343 = vmatpush.msrb.mxu0 %v115_v51  ;;  %382 = vmatpush.msrb.mxu2 %v148_v57  ;;  %v179_v42 = vld [vmem:[#allocation5 + $0x418] sm:$0xff]  ;;  %v196_v43 = vld [vmem:[#allocation5 + $0x4a0] sm:$0xff]  ;;  %v177_v47 = vld [vmem:[#allocation5 + $0x408] sm:$0xff] }
  0x45   :  { %363 = vmatpush.msrb.mxu1 %v131_v52  ;;  %402 = vmatpush.msrb.mxu3 %v164_v58  ;;  %v237_v44 = vld.sshfl [vmem:[#allocation1 + $0x10] sm:$0xff pattern:$0x73625140]  ;;  %v176_v49 = vld [vmem:[#allocation5 + $0x400] sm:$0xff]  ;;  %v193_v50 = vld [vmem:[#allocation5 + $0x488] sm:$0xff] }
  0x46   :  { %344 = vmatpush.msrb.mxu0 %v114_v55  ;;  %307 = vmatmul.f32.vlgmr.msra.gmra.mxu2 %v228_v37  ;;  %v198_v37 = vld [vmem:[#allocation5 + $0x4b0] sm:$0xff]  ;;  %v195_v46 = vld [vmem:[#allocation5 + $0x498] sm:$0xff]  ;;  %v235_v51 = vld.sshfl [vmem:[#allocation1] sm:$0xff pattern:$0x73625140] }
  0x47   :  { %364 = vmatpush.msrb.mxu1 %v130_v56  ;;  %383 = vmatpush.msrb.mxu2 %v147_v61  ;;  %v194_v48 = vld [vmem:[#allocation5 + $0x490] sm:$0xff]  ;;  %v192_v52 = vld [vmem:[#allocation5 + $0x480] sm:$0xff] }
  0x48   :  { %345 = vmatpush.msrb.mxu0 %v113_v59  ;;  %327 = vmatmul.f32.vlgmr.msra.gmra.mxu3 %v229_v39  ;;  %v180_v39 = vld [vmem:[#allocation5 + $0x420] sm:$0xff]  ;;  %v236_v53 = vld.sshfl [vmem:[#allocation1 + $0x8] sm:$0xff pattern:$0x73625140] }
  0x49   :  { %365 = vmatpush.msrb.mxu1 %v129_v60  ;;  %267 = vmatmul.f32.vlgmr.msra.gmra.mxu0 %v226_v38  ;;  %v209_v38 = vld [vmem:[#allocation5 + $0x508] sm:$0xff]  ;;  %v496_v54 = vld [vmem:[%s617_s2] ss:$0 sm:$0xff]  ;;  %s579_s2 = smov [#allocation7]  }
  0x4a   :  { %346 = vmatpush.msrb.mxu0 %v112_v62  ;;  %384 = vmatpush.msrb.mxu2 %v146_v1  ;;  %s477_s24 = sshll.u32 %s579_s2, 4  ;;  %s478_s24 = int_to_ptr.vmem [resolvable:$true] %s477_s24 }
  0x4b   :  { %366 = vmatpush.msrb.mxu1 %v128_v63  ;;  %403 = vmatpush.msrb.mxu3 %v163_v2 }
  0x4c   :  { %411 = vmatpush.msra.mxu0 %v191_v0  ;;  %287 = vmatmul.f32.vlgmr.msra.gmra.mxu1 %v606_v40  ;;  %v197_v40 = vld [vmem:[#allocation5 + $0x4a8] sm:$0xff] }
  0x4d   :  { %431 = vmatpush.msra.mxu1 %v207_v4  ;;  %385 = vmatpush.msrb.mxu2 %v145_v5 }
  0x4e   :  { %412 = vmatpush.msra.mxu0 %v190_v3  ;;  %404 = vmatpush.msrb.mxu3 %v162_v6 }
  0x4f   :  { %432 = vmatpush.msra.mxu1 %v206_v8  ;;  %386 = vmatpush.msrb.mxu2 %v144_v9 }
  0x50   :  { %413 = vmatpush.msra.mxu0 %v189_v7  ;;  %405 = vmatpush.msrb.mxu3 %v161_v10 }
  0x51   :  { %387 = vmatmul.f32.vlgmr.msrb.gmra.mxu2 %v232_v11  ;;  %433 = vmatpush.msra.mxu1 %v205_v13 }
  0x52   :  { %414 = vmatpush.msra.mxu0 %v188_v12  ;;  %406 = vmatpush.msrb.mxu3 %v160_v14 }
  0x53   :  { %347 = vmatmul.f32.vlgmr.msrb.gmra.mxu0 %v230_v15  ;;  %407 = vmatmul.f32.vlgmr.msrb.gmra.mxu3 %v233_v16 }
  0x54   :  { %415 = vmatpush.msra.mxu0 %v187_v17  ;;  %434 = vmatpush.msra.mxu1 %v204_v18 }
  0x55   :  { %367 = vmatmul.f32.vlgmr.msrb.gmra.mxu1 %v231_v19  ;;  %459 = vmatpush.msra.mxu2 %v215_v20 }
  0x56   :  { %416 = vmatpush.msra.mxu0 %v186_v21  ;;  %435 = vmatpush.msra.mxu1 %v203_v22 }
  0x57   :  { %460 = vmatpush.msra.mxu2 %v214_v23 }
  0x58   :  { %417 = vmatpush.msra.mxu0 %v185_v24  ;;  %436 = vmatpush.msra.mxu1 %v202_v25 }
  0x59   :  { %461 = vmatpush.msra.mxu2 %v213_v26 }
  0x5a   :  { %418 = vmatpush.msra.mxu0 %v184_v27  ;;  %437 = vmatpush.msra.mxu1 %v201_v28 }
  0x5b   :  { %462 = vmatpush.msra.mxu2 %v212_v29 }
  0x5c   :  { %419 = vmatpush.msra.mxu0 %v183_v30  ;;  %438 = vmatpush.msra.mxu1 %v200_v31 }
  0x5d   :  { %463 = vmatpush.msra.mxu2 %v211_v32 }
  0x5e   :  { %420 = vmatpush.msra.mxu0 %v182_v33  ;;  %439 = vmatpush.msra.mxu1 %v199_v34 }
  0x5f   :  { %464 = vmatpush.msra.mxu2 %v210_v35 }
  0x60   :  { %421 = vmatpush.msra.mxu0 %v181_v36  ;;  %440 = vmatpush.msra.mxu1 %v198_v37 }
  0x61   :  { %465 = vmatpush.msra.mxu2 %v209_v38 }
  0x62   :  { %422 = vmatpush.msra.mxu0 %v180_v39  ;;  %441 = vmatpush.msra.mxu1 %v197_v40 }
  0x63   :  { %466 = vmatpush.msra.mxu2 %v208_v41 }
  0x64   :  { %423 = vmatpush.msra.mxu0 %v179_v42  ;;  %442 = vmatpush.msra.mxu1 %v196_v43 }
  0x65   :  { %490 = vmatmul.msk.f32.vlgmr.msra.gmra.mxu2 %vm248_vm0, %v237_v44 }
  0x66   :  { %424 = vmatpush.msra.mxu0 %v178_v45  ;;  %443 = vmatpush.msra.mxu1 %v195_v46 }
  0x68   :  { %425 = vmatpush.msra.mxu0 %v177_v47  ;;  %444 = vmatpush.msra.mxu1 %v194_v48 }
  0x6a   :  { %426 = vmatpush.msra.mxu0 %v176_v49  ;;  %445 = vmatpush.msra.mxu1 %v193_v50 }
  0x6b   :  { %427 = vmatmul.f32.vlgmr.msra.gmra.mxu0 %v235_v51 }
  0x6c   :  { %446 = vmatpush.msra.mxu1 %v192_v52 }
  0x6d   :  { %447 = vmatmul.f32.vlgmr.msra.gmra.mxu1 %v236_v53 }
  0xc6   :  { %v268_v55 = vpop.f32.mrf.mxu0 }
  0xc7   :  { %v269_v56 = vadd.f32 %v496_v54, %v268_v55 }
  0xc9   :  { %v288_v57 = vpop.f32.mrf.mxu1  ;;  %v308_v59 = vpop.f32.mrf.mxu2 }
  0xca   :  { %v289_v58 = vadd.f32 %v288_v57, %v269_v56 }
  0xcb   :  { %v328_v61 = vpop.f32.mrf.mxu3 }
  0xcc   :  { %v309_v60 = vadd.f32 %v308_v59, %v289_v58 }
  0xce   :  { %v329_v62 = vadd.f32 %v328_v61, %v309_v60 }
  0xd0   :  { %v348_v63 = vpop.f32.mrf.mxu0 }
  0xd1   :  { %v349_v0 = vadd.f32 %v348_v63, %v329_v62 }
  0xd2   :  { %v368_v1 = vpop.f32.mrf.mxu1 }
  0xd3   :  { %v369_v2 = vadd.f32 %v368_v1, %v349_v0 }
  0xd4   :  { %v388_v3 = vpop.f32.mrf.mxu2 }
  0xd5   :  { %v389_v4 = vadd.f32 %v388_v3, %v369_v2 }
  0xd6   :  { %v408_v5 = vpop.f32.mrf.mxu3 }
  0xd7   :  { %v409_v6 = vadd.f32 %v408_v5, %v389_v4 }
  0xe8   :  { %v428_v7 = vpop.f32.mrf.mxu0  ;;  %v468_v10 = vpop.f32.mrf.mxu2 }
  0xe9   :  { %v429_v8 = vadd.f32 %v428_v7, %v409_v6 }
  0xea   :  { %v448_v9 = vpop.f32.mrf.mxu1 }
  0xeb   :  { %v449_v11 = vadd.f32 %v448_v9, %v429_v8 }
  0xed   :  { %v469_v12 = vadd.f32 %v468_v10, %v449_v11 }
  0xef   :  { %471 = vst [vmem:[#allocation7] sm:$0x3] %v469_v12 }
  0xf0   :  { %482 = dma.vmem_to_hbm [thread:$0]  %s478_s24, 32, %s480_s27, [#allocation4]  }
  0xf1   :  { %573 = dma.done.wait [#allocation4], 32  }
  0xf2   :  { %574 = vsyncadd [#allocation4], 4294967264 }
  0xf3   :  { %487 = vsyncpa [#allocation3], 1 }
  0xf4   :  { %488 = vsyncpa [#allocation6], 1 }
  0xf5   :  { %489 = vsyncpa [#allocation4], 1 }

</bundles_post_ra>
